<compile_context>
chip_gen: v7x
topology: tpu7x:2x2x1
jax: 0.10.0
libtpu: 0.0.40
codegen_flags: <defaults>
</compile_context>

<pallas_src>
import functools

import jax
import jax.numpy as jnp
from jax.experimental import pallas as pl
from jax.experimental.pallas import tpu as pltpu

PAD = 128          # lane width: all feature dims padded to this inside the kernel
NEG_BIG = -1e30    # bias for padded output lanes -> excluded from softmax


def _ceil_to(v, m):
    return -(-v // m) * m


def _net_kernel(x_ref, w_ref, b_ref, out_ref, *, n_states, act_pad):
    tb = x_ref.shape[0]

    # Lane-pad the (tb, n_states) input tile to a dense (tb, PAD) value in VMEM.
    x_small = x_ref[...]                                          # (tb, n_states) f32
    x = jnp.concatenate(
        [x_small, jnp.zeros((tb, PAD - n_states), jnp.float32)], axis=-1)

    b_all = b_ref[...]                                            # (4, PAD) f32

    def linear(h, idx):
        # bf16 operands feed the MXU at full rate; accumulate in f32.
        return jnp.dot(h.astype(jnp.bfloat16), w_ref[idx],
                       preferred_element_type=jnp.float32) + b_all[idx:idx + 1, :]

    h = jnp.maximum(linear(x, 0), 0.0)        # fc1 + relu
    h = jnp.maximum(linear(h, 1), 0.0)        # fc2 + relu
    h = jnp.maximum(linear(h, 2), 0.0)        # fc3 + relu
    logits = linear(h, 3)                     # padded action lanes get NEG_BIG bias

    # Numerically stable log_softmax over the lane dim (exp/log run on the EUP).
    m = jnp.max(logits, axis=-1, keepdims=True)
    shifted = logits - m
    lse = jnp.log(jnp.sum(jnp.exp(shifted), axis=-1, keepdims=True))
    logprobs = shifted - lse                                      # (tb, PAD) f32

    # Emit a small transposed (act_pad, tb) block instead of the full (tb, PAD) slab:
    # out[a, b] = logprobs[b, a].  Transpose + column-slice are fused into one exact
    # 0/1-selector NT matmul on the MXU (no XLU transpose, 16x smaller HBM write).
    rows = jax.lax.broadcasted_iota(jnp.int32, (act_pad, PAD), 0)
    cols = jax.lax.broadcasted_iota(jnp.int32, (act_pad, PAD), 1)
    sel = (rows == cols).astype(jnp.float32)                      # (act_pad, PAD)
    out_t = jax.lax.dot_general(sel, logprobs,
                                (((1,), (1,)), ((), ())),         # contract lane dims
                                preferred_element_type=jnp.float32)
    out_ref[...] = out_t.astype(out_ref.dtype)


def init_params(key, n_states, n_actions, hidden_size, pad=PAD):
    """Mirrors the PyTorch init:
       fc1..fc3: kaiming_normal (fan_in, relu) -> std = sqrt(2/fan_in), bias 0.1
       out:      normal(0, 0.1),                          bias 0.1
       Weights stored (in, out), zero-padded to (pad, pad), packed & cast to bf16.
       Biases padded with 0 (hidden layers) / NEG_BIG (output layer)."""
    assert n_states <= pad and n_actions <= pad and hidden_size <= pad
    k1, k2, k3, k4 = jax.random.split(key, 4)

    def kaiming(k, fan_in, fan_out):
        std = jnp.sqrt(2.0 / fan_in)
        return jax.random.normal(k, (fan_in, fan_out), jnp.float32) * std

    w1 = kaiming(k1, n_states, hidden_size)
    w2 = kaiming(k2, hidden_size, hidden_size)
    w3 = kaiming(k3, hidden_size, hidden_size)
    wo = jax.random.normal(k4, (hidden_size, n_actions), jnp.float32) * 0.1

    def pad_w(w):
        return jnp.zeros((pad, pad), jnp.float32).at[:w.shape[0], :w.shape[1]].set(w)

    w_pack = jnp.stack([pad_w(w1), pad_w(w2), pad_w(w3), pad_w(wo)]).astype(jnp.bfloat16)

    def pad_b(n_real, fill):
        return jnp.full((pad,), fill, jnp.float32).at[:n_real].set(0.1)

    b_pack = jnp.stack([
        pad_b(hidden_size, 0.0),
        pad_b(hidden_size, 0.0),
        pad_b(hidden_size, 0.0),
        pad_b(n_actions, NEG_BIG),   # mask padded logit lanes out of the softmax
    ])

    return {"w_pack": w_pack, "b_pack": b_pack}


@functools.partial(jax.jit,
                   static_argnames=("n_states", "n_actions", "hidden_size", "batch_tile"))
def net_forward(x, w_pack, b_pack, *, n_states, n_actions, hidden_size,
                batch_tile=1024):
    """x: [B, n_states] float32. Returns [B, n_actions] log-probabilities (f32)."""
    B = x.shape[0]
    act_pad = _ceil_to(max(n_actions, 8), 8)

    # Batch tiling:
    #  - small batches: one grid step, tile = ceil(B, 16)  (bf16 LHS vregs are (16,128))
    #  - larger batches: tiles are multiples of 128 (lane-dense transposed output
    #    blocks) and the grid always has >= 2 steps so both v7x TensorCores get work.
    if B <= 128:
        tb = _ceil_to(max(B, 16), 16)
        Bp = tb
    else:
        tb = _ceil_to(min(batch_tile, _ceil_to(-(-B // 2), 128)), 128)
        Bp = _ceil_to(B, tb)

    x_p = x.astype(jnp.float32)
    if Bp != B:
        x_p = jnp.pad(x_p, ((0, Bp - B), (0, 0)))     # pad batch rows only (tiny)

    # Advisory cost from real (unpadded) dims: this is a tiny, mem-bound call.
    flops = 2 * B * (n_states * hidden_size
                     + 2 * hidden_size * hidden_size
                     + hidden_size * n_actions)
    transcendentals = B * (n_actions + 1)
    bytes_accessed = (B * n_states * 4 + w_pack.size * 2 + b_pack.size * 4
                      + B * n_actions * 4)

    kernel = functools.partial(_net_kernel, n_states=n_states, act_pad=act_pad)

    out_t = pl.pallas_call(
        kernel,
        out_shape=jax.ShapeDtypeStruct((act_pad, Bp), jnp.float32),
        grid=(Bp // tb,),
        in_specs=[
            pl.BlockSpec((tb, n_states), lambda i: (i, 0)),    # unpadded input rows
            pl.BlockSpec(w_pack.shape, lambda i: (0, 0, 0)),   # resident packed weights
            pl.BlockSpec(b_pack.shape, lambda i: (0, 0)),      # resident packed biases
        ],
        out_specs=pl.BlockSpec((act_pad, tb), lambda i: (0, i)),
        compiler_params=pltpu.CompilerParams(
            dimension_semantics=("parallel",)),
        cost_estimate=pl.CostEstimate(flops=flops,
                                      transcendentals=transcendentals,
                                      bytes_accessed=bytes_accessed),
    )(x_p, w_pack, b_pack)

    # (act_pad, Bp) -> (B, n_actions); tiny slice + transpose on the XLA side.
    return out_t[:n_actions, :B].T


def _ref_forward(x, w_pack, b_pack, n_states, n_actions):
    """Pure-JAX reference using the same padded/bf16 parameters."""
    B = x.shape[0]
    xp = jnp.zeros((B, PAD), jnp.float32).at[:, :n_states].set(x.astype(jnp.float32))
    h = xp
    for i in range(4):
        h = jnp.dot(h.astype(jnp.bfloat16), w_pack[i],
                    preferred_element_type=jnp.float32) + b_pack[i][None, :]
        if i < 3:
            h = jnp.maximum(h, 0.0)
    return jax.nn.log_softmax(h, axis=-1)[:, :n_actions]


if __name__ == "__main__":
    n_states, n_actions, hidden_size = 4, 2, 32

    key = jax.random.PRNGKey(0)
    pkey, xkey = jax.random.split(key)
    params = init_params(pkey, n_states, n_actions, hidden_size)

    # Exercise both the single-step (small batch) and multi-step (2 grid iters) paths.
    for batch in (8, 260):
        xkey, sub = jax.random.split(xkey)
        x = jax.random.normal(sub, (batch, n_states), jnp.float32)

        logprobs = net_forward(x, params["w_pack"], params["b_pack"],
                               n_states=n_states, n_actions=n_actions,
                               hidden_size=hidden_size)
        logprobs = jax.block_until_ready(logprobs)

        assert logprobs.shape == (batch, n_actions)
        # rows of exp(logprobs) must sum to 1
        row_sums = jnp.sum(jnp.exp(logprobs), axis=-1)
        assert bool(jnp.allclose(row_sums, 1.0, atol=1e-4))
        # match the pure-JAX reference (same bf16 weights, f32 accumulation)
        ref = _ref_forward(x, params["w_pack"], params["b_pack"], n_states, n_actions)
        assert bool(jnp.allclose(logprobs, ref, atol=1e-2, rtol=1e-2))

    print("KERNEL_OK")
</pallas_src>

<mosaic_0001>
module attributes {stable_mosaic.version = 11 : i64} {
  func.func @_net_kernel(%arg0: i32, %arg1: memref<16x4xf32, #tpu.memory_space<vmem>>, %arg2: memref<4x128x128xbf16, #tpu.memory_space<vmem>>, %arg3: memref<4x128xf32, #tpu.memory_space<vmem>>, %arg4: memref<8x16xf32, #tpu.memory_space<vmem>>) attributes {dimension_semantics = [#tpu.dimension_semantics<parallel>], iteration_bounds = array<i64: 1>, scalar_prefetch = 0 : i64, scratch_operands = 0 : i64, tpu.core_type = #tpu.core_type<tc>, window_params = [{transform_indices = @transform_0, window_bounds = array<i64: 16, 4>}, {pipeline_mode = #tpu.pipeline_mode<synchronous>, transform_indices = @transform_1, window_bounds = array<i64: 4, 128, 128>}, {pipeline_mode = #tpu.pipeline_mode<synchronous>, transform_indices = @transform_2, window_bounds = array<i64: 4, 128>}, {transform_indices = @transform_3, window_bounds = array<i64: 8, 16>}]} {
    %c0 = arith.constant 0 : index
    %c0_0 = arith.constant 0 : index
    %0 = vector.load %arg1[%c0, %c0_0] : memref<16x4xf32, #tpu.memory_space<vmem>>, vector<16x4xf32>
    %cst = arith.constant 0.000000e+00 : f32
    %1 = vector.broadcast %cst : f32 to vector<16x124xf32>
    %2 = tpu.concatenate %0, %1 in 1 : vector<16x4xf32>, vector<16x124xf32> -> vector<16x128xf32>
    %c0_1 = arith.constant 0 : index
    %c0_2 = arith.constant 0 : index
    %3 = vector.load %arg3[%c0_1, %c0_2] : memref<4x128xf32, #tpu.memory_space<vmem>>, vector<4x128xf32>
    %4 = arith.truncf %2 : vector<16x128xf32> to vector<16x128xbf16>
    %c0_3 = arith.constant 0 : index
    %c0_4 = arith.constant 0 : index
    %c0_5 = arith.constant 0 : index
    %5 = vector.load %arg2[%c0_3, %c0_4, %c0_5] : memref<4x128x128xbf16, #tpu.memory_space<vmem>>, vector<1x128x128xbf16>
    %6 = vector.shape_cast %5 : vector<1x128x128xbf16> to vector<128x128xbf16>
    %cst_6 = arith.constant dense<0.000000e+00> : vector<16x128xf32>
    %7 = tpu.matmul %4, %6, %cst_6 {dimension_numbers = #tpu.dot_dimension_numbers<[1], [0], [0], [1], [0, 0, 1, 1], [], []>} : vector<16x128xbf16>, vector<128x128xbf16>, vector<16x128xf32> -> vector<16x128xf32>
    %8 = vector.extract_strided_slice %3 {offsets = [0, 0], sizes = [1, 128], strides = [1, 1]} : vector<4x128xf32> to vector<1x128xf32>
    %9 = vector.broadcast %8 : vector<1x128xf32> to vector<16x128xf32>
    %10 = arith.addf %7, %9 : vector<16x128xf32>
    %cst_7 = arith.constant 0.000000e+00 : f32
    %11 = vector.broadcast %cst_7 : f32 to vector<16x128xf32>
    %12 = arith.maximumf %10, %11 : vector<16x128xf32>
    %13 = arith.truncf %12 : vector<16x128xf32> to vector<16x128xbf16>
    %c1 = arith.constant 1 : index
    %c0_8 = arith.constant 0 : index
    %c0_9 = arith.constant 0 : index
    %14 = vector.load %arg2[%c1, %c0_8, %c0_9] : memref<4x128x128xbf16, #tpu.memory_space<vmem>>, vector<1x128x128xbf16>
    %15 = vector.shape_cast %14 : vector<1x128x128xbf16> to vector<128x128xbf16>
    %cst_10 = arith.constant dense<0.000000e+00> : vector<16x128xf32>
    %16 = tpu.matmul %13, %15, %cst_10 {dimension_numbers = #tpu.dot_dimension_numbers<[1], [0], [0], [1], [0, 0, 1, 1], [], []>} : vector<16x128xbf16>, vector<128x128xbf16>, vector<16x128xf32> -> vector<16x128xf32>
    %17 = vector.extract_strided_slice %3 {offsets = [1, 0], sizes = [1, 128], strides = [1, 1]} : vector<4x128xf32> to vector<1x128xf32>
    %18 = vector.broadcast %17 : vector<1x128xf32> to vector<16x128xf32>
    %19 = arith.addf %16, %18 : vector<16x128xf32>
    %cst_11 = arith.constant 0.000000e+00 : f32
    %20 = vector.broadcast %cst_11 : f32 to vector<16x128xf32>
    %21 = arith.maximumf %19, %20 : vector<16x128xf32>
    %22 = arith.truncf %21 : vector<16x128xf32> to vector<16x128xbf16>
    %c2 = arith.constant 2 : index
    %c0_12 = arith.constant 0 : index
    %c0_13 = arith.constant 0 : index
    %23 = vector.load %arg2[%c2, %c0_12, %c0_13] : memref<4x128x128xbf16, #tpu.memory_space<vmem>>, vector<1x128x128xbf16>
    %24 = vector.shape_cast %23 : vector<1x128x128xbf16> to vector<128x128xbf16>
    %cst_14 = arith.constant dense<0.000000e+00> : vector<16x128xf32>
    %25 = tpu.matmul %22, %24, %cst_14 {dimension_numbers = #tpu.dot_dimension_numbers<[1], [0], [0], [1], [0, 0, 1, 1], [], []>} : vector<16x128xbf16>, vector<128x128xbf16>, vector<16x128xf32> -> vector<16x128xf32>
    %26 = vector.extract_strided_slice %3 {offsets = [2, 0], sizes = [1, 128], strides = [1, 1]} : vector<4x128xf32> to vector<1x128xf32>
    %27 = vector.broadcast %26 : vector<1x128xf32> to vector<16x128xf32>
    %28 = arith.addf %25, %27 : vector<16x128xf32>
    %cst_15 = arith.constant 0.000000e+00 : f32
    %29 = vector.broadcast %cst_15 : f32 to vector<16x128xf32>
    %30 = arith.maximumf %28, %29 : vector<16x128xf32>
    %31 = arith.truncf %30 : vector<16x128xf32> to vector<16x128xbf16>
    %c3 = arith.constant 3 : index
    %c0_16 = arith.constant 0 : index
    %c0_17 = arith.constant 0 : index
    %32 = vector.load %arg2[%c3, %c0_16, %c0_17] : memref<4x128x128xbf16, #tpu.memory_space<vmem>>, vector<1x128x128xbf16>
    %33 = vector.shape_cast %32 : vector<1x128x128xbf16> to vector<128x128xbf16>
    %cst_18 = arith.constant dense<0.000000e+00> : vector<16x128xf32>
    %34 = tpu.matmul %31, %33, %cst_18 {dimension_numbers = #tpu.dot_dimension_numbers<[1], [0], [0], [1], [0, 0, 1, 1], [], []>} : vector<16x128xbf16>, vector<128x128xbf16>, vector<16x128xf32> -> vector<16x128xf32>
    %35 = vector.extract_strided_slice %3 {offsets = [3, 0], sizes = [1, 128], strides = [1, 1]} : vector<4x128xf32> to vector<1x128xf32>
    %36 = vector.broadcast %35 : vector<1x128xf32> to vector<16x128xf32>
    %37 = arith.addf %34, %36 : vector<16x128xf32>
    %cst_19 = arith.constant dense<0xFF800000> : vector<16xf32>
    %38 = vector.multi_reduction <maximumf>, %37, %cst_19 [1] : vector<16x128xf32> to vector<16xf32>
    %39 = vector.shape_cast %38 : vector<16xf32> to vector<16x1xf32>
    %40 = vector.broadcast %39 : vector<16x1xf32> to vector<16x128xf32>
    %41 = arith.subf %37, %40 : vector<16x128xf32>
    %42 = math.exp %41 : vector<16x128xf32>
    %cst_20 = arith.constant dense<0.000000e+00> : vector<16xf32>
    %43 = vector.multi_reduction <add>, %42, %cst_20 [1] : vector<16x128xf32> to vector<16xf32>
    %44 = vector.shape_cast %43 : vector<16xf32> to vector<16x1xf32>
    %45 = math.log %44 : vector<16x1xf32>
    %46 = vector.broadcast %45 : vector<16x1xf32> to vector<16x128xf32>
    %47 = arith.subf %41, %46 : vector<16x128xf32>
    %48 = tpu.iota {dimensions = array<i32: 0>} : vector<8x128xi32>
    %49 = tpu.iota {dimensions = array<i32: 1>} : vector<8x128xi32>
    %50 = arith.cmpi eq, %48, %49 : vector<8x128xi32>
    %51 = arith.extui %50 : vector<8x128xi1> to vector<8x128xi32>
    %52 = arith.sitofp %51 : vector<8x128xi32> to vector<8x128xf32>
    %cst_21 = arith.constant dense<0.000000e+00> : vector<8x16xf32>
    %53 = tpu.matmul %52, %47, %cst_21 {dimension_numbers = #tpu.dot_dimension_numbers<[1], [1], [0], [0], [0, 0, 1, 0], [], []>} : vector<8x128xf32>, vector<16x128xf32>, vector<8x16xf32> -> vector<8x16xf32>
    %c0_22 = arith.constant 0 : index
    %c0_23 = arith.constant 0 : index
    %54 = vector.load %arg4[%c0_22, %c0_23] : memref<8x16xf32, #tpu.memory_space<vmem>>, vector<8x16xf32>
    tpu.vector_store %arg4[%c0_22, %c0_23], %53 {strides = array<i32>} : memref<8x16xf32, #tpu.memory_space<vmem>>, vector<8x16xf32>,
    return
  }
  func.func @transform_0(%arg0: i32) -> (i32, i32) {
    %c0_i32 = arith.constant 0 : i32
    %c0_i32_0 = arith.constant 0 : i32
    return %arg0, %c0_i32 : i32, i32
  }
  func.func @transform_1(%arg0: i32) -> (i32, i32, i32) {
    %c0_i32 = arith.constant 0 : i32
    %c0_i32_0 = arith.constant 0 : i32
    %c0_i32_1 = arith.constant 0 : i32
    %c0_i32_2 = arith.constant 0 : i32
    return %c0_i32, %c0_i32_0, %c0_i32_1 : i32, i32, i32
  }
  func.func @transform_2(%arg0: i32) -> (i32, i32) {
    %c0_i32 = arith.constant 0 : i32
    %c0_i32_0 = arith.constant 0 : i32
    %c0_i32_1 = arith.constant 0 : i32
    return %c0_i32, %c0_i32_0 : i32, i32
  }
  func.func @transform_3(%arg0: i32) -> (i32, i32) {
    %c0_i32 = arith.constant 0 : i32
    %c0_i32_0 = arith.constant 0 : i32
    return %c0_i32, %arg0 : i32, i32
  }
}

</mosaic_0001>

<bundles_post_ra>
// kernel: net_forward.1
= control target key start
LH: loop header
LB: loop body
LE: loop exit
PB: predicated region body
PF: predicated region fallthrough
CT: control target
= control target key end

     0   :  { %8 = vsyncpa [#allocation3], 0  ;;  %s825_s12 = smov [#allocation2]   ;;  %s933_s0 = inlined_call_operand.vmem [shape: f32[16,4], index: 0, kind: input, shape index: {}]   ;;  %s934_s1 = inlined_call_operand.hbm [shape: bf16[4,128,128], index: 1, kind: input, shape index: {}]   ;;  %s935_s2 = inlined_call_operand.vmem [shape: f32[4,128], index: 2, kind: input, shape index: {}]   ;;  %s936_s3 = inlined_call_operand.vmem [shape: f32[8,16], index: 3, kind: output, shape index: {}]  }
   0x1   :  { %s16_s13 = sshll.u32 %s825_s12, 4  ;;  %s801_s16 = scalar_lea.hbm %s934_s1, 4096  ;;  %s17_s13 = int_to_ptr.vmem [resolvable:$true] %s16_s13 }
   0x2   :  { %p802_p0 = scmp.ne.s32.totalorder %s934_s1, %s801_s16  ;;  %p805_p1 = scmp.lt.u32.totalorder %s801_s16, %s934_s1 }
   0x4   :  { %p807_p2 = pnand %p805_p1, %p802_p0 }
   0x6   :  { %810 = shalt.err (!%p807_p2)
}
   0x7   :  { %s811_s21 = scalar_lea.vmem %s17_s13, 4096  ;;  %p816_p4 = scmp.lt.s32.totalorder %s17_s13, %s17_s13 }
   0x8   :  { %p812_p3 = scmp.ne.s32.totalorder %s17_s13, %s811_s21  ;;  %p817_p5 = scmp.lt.s32.totalorder %s811_s21, %s811_s21 }
   0xa   :  { %p818_p6 = por %p817_p5, %p816_p4 }
   0xc   :  { %p819_p7 = pnand %p818_p6, %p812_p3 }
   0xe   :  { %822 = shalt.err (!%p819_p7)
}
   0xf   :  { %s826_s22 = smov 64   ;;  %s827_s23 = smov 4  }
  0x10   :  { %22 = dma.hbm_to_vmem [thread:$0]  %s934_s1, 4096, %s17_s13, [#allocation3], %s826_s22, %s826_s22, %s827_s23  }
  0x11   :  { %823 = dma.done.wait [#allocation3], 4096  }
  0x12   :  { %824 = vsyncadd [#allocation3], 4294963200  ;;  %v828_v0 = vmov 0.0   ;;  %vm829_vm0 = vmmov 0   ;;  %v761_v1 = vld [vmem:[#allocation2] sm:$0xff]   ;;  %v762_v2 = vld [vmem:[#allocation2 + $0x8] sm:$0xff]   ;;  %v52_v26 = vlaneseq }
  0x13   :  { %664 = vmatprep.subr.bf16.mxu0 %v828_v0  ;;  %680 = vmatprep.mubr.msk.bf16.mxu0 %vm829_vm0, %v828_v0  ;;  %v763_v3 = vld [vmem:[#allocation2 + $0x10] sm:$0xff]   ;;  %v769_v4 = vld [vmem:[#allocation2 + $0x40] sm:$0xff]   ;;  %v764_v5 = vld [vmem:[#allocation2 + $0x18] sm:$0xff]   ;;  %vm31_vm1 = vcmask 31744   ;;  %vm581_vm4 = vcmask 130048  }
  0x14   :  { %684 = vmatprep.subr.bf16.mxu1 %v828_v0  ;;  %700 = vmatprep.mubr.msk.bf16.mxu1 %vm829_vm0, %v828_v0  ;;  %v770_v6 = vld [vmem:[#allocation2 + $0x48] sm:$0xff]   ;;  %v765_v7 = vld [vmem:[#allocation2 + $0x20] sm:$0xff]   ;;  %v771_v8 = vld [vmem:[#allocation2 + $0x50] sm:$0xff]   ;;  %v901_v27 = vshrl.u32 %v52_v26, 7 }
  0x15   :  { %665 = vmatpush3.bf16.msra.mxu0 %v761_v1  ;;  %685 = vmatpush3.bf16.msra.mxu1 %v769_v4  ;;  %v766_v9 = vld [vmem:[#allocation2 + $0x28] sm:$0xff]   ;;  %v772_v10 = vld [vmem:[#allocation2 + $0x58] sm:$0xff]   ;;  %v767_v11 = vld [vmem:[#allocation2 + $0x30] sm:$0xff]  }
  0x16   :  { %666 = vmatprep.subr.bf16.mxu0 %v828_v0  ;;  %686 = vmatprep.subr.bf16.mxu1 %v828_v0  ;;  %v773_v12 = vld [vmem:[#allocation2 + $0x60] sm:$0xff]   ;;  %v768_v13 = vld [vmem:[#allocation2 + $0x38] sm:$0xff]   ;;  %v30_v15 = vld [vmem:[%s933_s0 + $0x8] sm:$0xff]  ;;  %v54_v28 = vsub.s32 0, %v901_v27  ;;  %v167_v48 = vsub.s32 1, %v901_v27  ;;  %v280_v61 = vsub.s32 2, %v901_v27 }
  0x17   :  { %v29_v14 = vld [vmem:[%s933_s0] sm:$0xff]  ;;  %v774_v16 = vld [vmem:[#allocation2 + $0x68] sm:$0xff]   ;;  %vm596_vm2 = vmpackc.low %vm31_vm1, %vm31_vm1 }
  0x18   :  { %v597_v17 = vpack.c.bf16 %v30_v15, %v29_v14  ;;  %v775_v18 = vld [vmem:[#allocation2 + $0x70] sm:$0xff]   ;;  %v776_v19 = vld [vmem:[#allocation2 + $0x78] sm:$0xff]   ;;  %v777_v20 = vld [vmem:[#allocation2 + $0x80] sm:$0xff]  }
  0x19   :  { %667 = vmatpush3.bf16.msra.mxu0 %v762_v2  ;;  %687 = vmatpush3.bf16.msra.mxu1 %v770_v6  ;;  %v778_v21 = vld [vmem:[#allocation2 + $0x88] sm:$0xff]   ;;  %v779_v22 = vld [vmem:[#allocation2 + $0x90] sm:$0xff]   ;;  %v780_v23 = vld [vmem:[#allocation2 + $0x98] sm:$0xff]  }
  0x1a   :  { %668 = vmatprep.subr.bf16.mxu0 %v828_v0  ;;  %688 = vmatprep.subr.bf16.mxu1 %v828_v0  ;;  %v781_v24 = vld [vmem:[#allocation2 + $0xa0] sm:$0xff]   ;;  %v782_v25 = vld [vmem:[#allocation2 + $0xa8] sm:$0xff]   ;;  %v783_v40 = vld [vmem:[#allocation2 + $0xb0] sm:$0xff]  }
  0x1b   :  { %v907_v29 = vld [vmem:[%s935_s2] sm:$0xf]  ;;  %v784_v41 = vld [vmem:[#allocation2 + $0xb8] sm:$0xff]   ;;  %v786_v43 = vld [vmem:[#allocation2 + $0xc8] sm:$0xff]  }
  0x1c   :  { %v55_v30 = vrot.slane %v907_v29, %v54_v28  ;;  %v785_v42 = vld [vmem:[#allocation2 + $0xc0] sm:$0xff]   ;;  %v787_v44 = vld [vmem:[#allocation2 + $0xd0] sm:$0xff]   ;;  %v788_v45 = vld [vmem:[#allocation2 + $0xd8] sm:$0xff]   ;;  %v168_v49 = vrot.slane %v907_v29, %v167_v48  ;;  %v281_v62 = vrot.slane %v907_v29, %v280_v61 }
  0x1d   :  { %669 = vmatpush3.bf16.msra.mxu0 %v763_v3  ;;  %689 = vmatpush3.bf16.msra.mxu1 %v771_v8  ;;  %v789_v46 = vld [vmem:[#allocation2 + $0xe0] sm:$0xff]   ;;  %v790_v47 = vld [vmem:[#allocation2 + $0xe8] sm:$0xff]   ;;  %v791_v59 = vld [vmem:[#allocation2 + $0xf0] sm:$0xff]  }
  0x1e   :  { %670 = vmatprep.subr.bf16.mxu0 %v828_v0  ;;  %690 = vmatprep.subr.bf16.mxu1 %v828_v0  ;;  %v792_v60 = vld [vmem:[#allocation2 + $0xf8] sm:$0xff]  }
  0x21   :  { %671 = vmatpush3.bf16.msra.mxu0 %v764_v5  ;;  %691 = vmatpush3.bf16.msra.mxu1 %v772_v10 }
  0x22   :  { %672 = vmatprep.subr.bf16.mxu0 %v828_v0  ;;  %692 = vmatprep.subr.bf16.mxu1 %v828_v0 }
  0x25   :  { %673 = vmatpush3.bf16.msra.mxu0 %v765_v7  ;;  %693 = vmatpush3.bf16.msra.mxu1 %v773_v12 }
  0x26   :  { %674 = vmatprep.subr.bf16.mxu0 %v828_v0  ;;  %694 = vmatprep.subr.bf16.mxu1 %v828_v0 }
  0x29   :  { %675 = vmatpush3.bf16.msra.mxu0 %v766_v9  ;;  %695 = vmatpush3.bf16.msra.mxu1 %v774_v16  ;;  %v393_v9 = vsub.s32 3, %v901_v27 }
  0x2a   :  { %676 = vmatprep.subr.bf16.mxu0 %v828_v0  ;;  %696 = vmatprep.subr.bf16.mxu1 %v828_v0 }
  0x2d   :  { %677 = vmatpush3.bf16.msra.mxu0 %v767_v11  ;;  %697 = vmatpush3.bf16.msra.mxu1 %v775_v18 }
  0x2e   :  { %678 = vmatprep.subr.bf16.mxu0 %v828_v0  ;;  %698 = vmatprep.subr.bf16.mxu1 %v828_v0 }
  0x31   :  { %679 = vmatpush3.bf16.msra.mxu0 %v768_v13  ;;  %699 = vmatpush3.bf16.msra.mxu1 %v776_v19 }
  0x32   :  { %704 = vmatprep.subr.bf16.mxu0 %v828_v0  ;;  %724 = vmatprep.subr.bf16.mxu1 %v828_v0 }
  0x34   :  { %681 = vmatmul.mubr.msk.bf16.vlgmr.msra.gmra.mrb[0].mxu0 %vm596_vm2, %v597_v17 }
  0x35   :  { %720 = vmatprep.mubr.msk.bf16.mxu0 %vm829_vm0, %v828_v0  ;;  %705 = vmatpush3.bf16.msra.mxu0 %v777_v20 }
  0x36   :  { %706 = vmatprep.subr.bf16.mxu0 %v828_v0 }
  0x39   :  { %707 = vmatpush3.bf16.msra.mxu0 %v778_v21 }
  0x3a   :  { %708 = vmatprep.subr.bf16.mxu0 %v828_v0 }
  0x3d   :  { %709 = vmatpush3.bf16.msra.mxu0 %v779_v22 }
  0x3e   :  { %710 = vmatprep.subr.bf16.mxu0 %v828_v0 }
  0x41   :  { %711 = vmatpush3.bf16.msra.mxu0 %v780_v23 }
  0x42   :  { %712 = vmatprep.subr.bf16.mxu0 %v828_v0 }
  0x45   :  { %713 = vmatpush3.bf16.msra.mxu0 %v781_v24  ;;  %v830_v24 = vmov 0.0|0.0  }
  0x46   :  { %714 = vmatprep.subr.bf16.mxu0 %v828_v0 }
  0x49   :  { %715 = vmatpush3.bf16.msra.mxu0 %v782_v25 }
  0x4a   :  { %716 = vmatprep.subr.bf16.mxu0 %v828_v0 }
  0x4d   :  { %717 = vmatpush3.bf16.msra.mxu0 %v783_v40 }
  0x4e   :  { %718 = vmatprep.subr.bf16.mxu0 %v828_v0 }
  0x51   :  { %719 = vmatpush3.bf16.msra.mxu0 %v784_v41 }
  0x52   :  { %751 = vmatprep.subr.bf16.mxu0 %v830_v24 }
 0x107   :  { %v138_v31 = vpop.f32.mrb[0].mxu0 }
 0x108   :  { %v139_v32 = vadd.f32 %v138_v31, %v55_v30  ;;  %v682_v33 = vpop.f32.mrb[1].mxu0 }
 0x109   :  { %v141_v34 = vpop.f32.mrb[2].mxu0 }
 0x10a   :  { %v142_v35 = vadd.f32 %v141_v34, %v55_v30  ;;  %v683_v36 = vpop.f32.mrb[3].mxu0  ;;  %v145_v37 = vmax.f32 %v139_v32, 0.0 }
 0x10b   :  { %v507_v36 = vand.u32 127, %v52_v26 }
 0x10c   :  { %v146_v38 = vmax.f32 %v142_v35, 0.0 }
 0x10d   :  { %vm508_vm3 = vcmp.eq.s32.totalorder %v901_v27, %v507_v36 }
 0x10e   :  { %v147_v39 = vpack.c.bf16 %v146_v38, %v145_v37  ;;  %v831_v37 = vmov 1.0  }
 0x110   :  { %701 = vmatmul.mubr.bf16.vlgmr.msra.gmra.mrb[0].mxu1 %v147_v39 }
 0x111   :  { %740 = vmatprep.mubr.msk.bf16.mxu1 %vm829_vm0, %v828_v0  ;;  %725 = vmatpush3.bf16.msra.mxu1 %v785_v42 }
 0x112   :  { %726 = vmatprep.subr.bf16.mxu1 %v828_v0 }
 0x115   :  { %727 = vmatpush3.bf16.msra.mxu1 %v786_v43 }
 0x116   :  { %728 = vmatprep.subr.bf16.mxu1 %v828_v0 }
 0x119   :  { %729 = vmatpush3.bf16.msra.mxu1 %v787_v44 }
 0x11a   :  { %730 = vmatprep.subr.bf16.mxu1 %v828_v0 }
 0x11d   :  { %731 = vmatpush3.bf16.msra.mxu1 %v788_v45 }
 0x11e   :  { %732 = vmatprep.subr.bf16.mxu1 %v828_v0 }
 0x121   :  { %733 = vmatpush3.bf16.msra.mxu1 %v789_v46 }
 0x122   :  { %734 = vmatprep.subr.bf16.mxu1 %v828_v0 }
 0x125   :  { %735 = vmatpush3.bf16.msra.mxu1 %v790_v47 }
 0x126   :  { %736 = vmatprep.subr.bf16.mxu1 %v828_v0 }
 0x129   :  { %737 = vmatpush3.bf16.msra.mxu1 %v791_v59 }
 0x12a   :  { %738 = vmatprep.subr.bf16.mxu1 %v828_v0 }
 0x12d   :  { %739 = vmatpush3.bf16.msra.mxu1 %v792_v60 }
 0x1e3   :  { %v251_v50 = vpop.f32.mrb[0].mxu1 }
 0x1e4   :  { %v252_v51 = vadd.f32 %v251_v50, %v168_v49  ;;  %v702_v52 = vpop.f32.mrb[1].mxu1 }
 0x1e5   :  { %v254_v53 = vpop.f32.mrb[2].mxu1 }
 0x1e6   :  { %v255_v54 = vadd.f32 %v254_v53, %v168_v49  ;;  %v703_v55 = vpop.f32.mrb[3].mxu1  ;;  %v258_v56 = vmax.f32 %v252_v51, 0.0 }
 0x1e8   :  { %v259_v57 = vmax.f32 %v255_v54, 0.0 }
 0x1ea   :  { %v260_v58 = vpack.c.bf16 %v259_v57, %v258_v56 }
 0x1ec   :  { %721 = vmatmul.mubr.bf16.vlgmr.msra.gmra.mrb[4].mxu0 %v260_v58 }
 0x1ed   :  { %748 = vmatprep.mubr.msk.f32.mxu0 %vm829_vm0, %v828_v0  ;;  %v394_v0 = vrot.slane %v907_v29, %v393_v9 }
 0x2bf   :  { %v364_v63 = vpop.f32.mrb[4].mxu0 }
 0x2c0   :  { %v365_v1 = vadd.f32 %v364_v63, %v281_v62  ;;  %v722_v2 = vpop.f32.mrb[5].mxu0 }
 0x2c1   :  { %v367_v3 = vpop.f32.mrb[6].mxu0 }
 0x2c2   :  { %v368_v4 = vadd.f32 %v367_v3, %v281_v62  ;;  %v723_v5 = vpop.f32.mrb[7].mxu0  ;;  %v371_v6 = vmax.f32 %v365_v1, 0.0 }
 0x2c4   :  { %v372_v7 = vmax.f32 %v368_v4, 0.0 }
 0x2c6   :  { %v373_v8 = vpack.c.bf16 %v372_v7, %v371_v6 }
 0x2c8   :  { %741 = vmatmul.mubr.bf16.vlgmr.msra.gmra.mrb[4].mxu1 %v373_v8 }
 0x39b   :  { %v477_v10 = vpop.f32.mrb[4].mxu1 }
 0x39c   :  { %v478_v11 = vadd.f32 %v477_v10, %v394_v0  ;;  %v742_v12 = vpop.f32.mrb[5].mxu1 }
 0x39d   :  { %v480_v13 = vpop.f32.mrb[6].mxu1 }
 0x39e   :  { %484 = vmax.xlane.f32.xlu0 %v478_v11  ;;  %v743_v14 = vpop.f32.mrb[7].mxu1  ;;  %v481_v15 = vadd.f32 %v480_v13, %v394_v0 }
 0x3a2   :  { %486 = vmax.xlane.f32.xlu0 %v481_v15 }
 0x42b   :  { %v485_v16 = vpop.xlane.xlu0 %484 }
 0x42c   :  { %v488_v17 = vsub.f32 %v478_v11, %v485_v16 }
 0x42e   :  { %v490_v18 = vmul.f32 1.442695, %v488_v17 }
 0x42f   :  { %v487_v19 = vpop.xlane.xlu0 %486 }
 0x430   :  { %v489_v20 = vsub.f32 %v481_v15, %v487_v19  ;;  %793 = vpow2.f32 %v490_v18 }
 0x432   :  { %v492_v21 = vmul.f32 1.442695, %v489_v20 }
 0x434   :  { %795 = vpow2.f32 %v492_v21 }
 0x43a   :  { %v794_v22 = vpop.eup %793 }
 0x43b   :  { %494 = vadd.xlane.f32.xlu1 %v794_v22 }
 0x43e   :  { %v796_v23 = vpop.eup %795 }
 0x43f   :  { %496 = vadd.xlane.f32.xlu1 %v796_v23 }
 0x4c8   :  { %v495_v25 = vpop.xlane.xlu1 %494 }
 0x4c9   :  { %797 = vlog2.f32 %v495_v25 }
 0x4cc   :  { %v497_v28 = vpop.xlane.xlu1 %496 }
 0x4cd   :  { %799 = vlog2.f32 %v497_v28 }
 0x4d3   :  { %v798_v29 = vpop.eup %797 }
 0x4d4   :  { %v499_v30 = vmul.f32 0.6931472, %v798_v29 }
 0x4d6   :  { %v502_v33 = vsub.f32 %v488_v17, %v499_v30 }
 0x4d7   :  { %v800_v31 = vpop.eup %799 }
 0x4d8   :  { %v501_v32 = vmul.f32 0.6931472, %v800_v31 }
 0x4da   :  { %v503_v34 = vsub.f32 %v489_v20, %v501_v32 }
 0x4dc   :  { %v752_v35 = vpack.c.bf16 %v503_v34, %v502_v33 }
 0x4de   :  { %753 = vmatpush3.bf16.xpose.msra.mxu0 %v752_v35 }
 0x4e5   :  { %749 = vmatmul.mubr.msk.f32.vlgmr.msra.gmra.mrb[8].mxu0 %vm508_vm3, %v831_v37 }
 0x5b8   :  { %v577_v38 = vpop.f32.mrb[8].mxu0 }
 0x5b9   :  { %582 = vst.msk [vmem:[%s936_s3] sm:$0xff] %vm581_vm4, %v577_v38  ;;  %v750_v39 = vpop.f32.mrb[9].mxu0 }
 0x5ba   :  { %587 = vsyncpa [#allocation3], 1 }

</bundles_post_ra>
